<compile_context>
chip_gen: v7x
topology: tpu7x:2x2x1
jax: 0.10.0
libtpu: 0.0.40
codegen_flags: <defaults>
</compile_context>

<pallas_src>
import math

import jax
import jax.numpy as jnp
from jax import lax
from jax.experimental import pallas as pl
from jax.experimental.pallas import tpu as pltpu

NODE_IN = 6                   # DihedralFeatures.node_in
EMBED_DIM = 16                # ModelParams.dihedral_embed_dim
EPS = 1e-6                    # Normalize.epsilon
N_PARAM_COLS = NODE_IN + 3    # [ W | linear bias | gain | norm bias ]
_VMEM_LIMIT = 32 * 1024 * 1024  # fits every generation (v7x physical = 64 MiB)


def _round_up(a, b):
    return ((a + b - 1) // b) * b


def _choose_tile(n, quantum, max_tile):
    """Pick a sample-axis tile.

    Tiny inputs get a single block equal to the full dim (exempt from the
    (8,128) divisibility rule). Otherwise the tile is a multiple of `quantum`
    and, when there are more than two grid steps, an even step count is
    preferred so v7x's two TensorCores stay balanced (harmless on v5e/v6e).
    """
    if n <= quantum:
        return n, 1
    tile = min(_round_up(max_tile, quantum), (n // quantum) * quantum)
    grid = -(-n // tile)
    if grid > 2 and grid % 2 == 1:
        tile = max(quantum, _round_up(-(-n // (grid + 1)), quantum))
        grid = -(-n // tile)
    return tile, grid


# ---------------------------------------------------------------------------
# Kernels
# ---------------------------------------------------------------------------

def _dihedral_fm_kernel(p_ref, x_ref, o_ref):
    """Feature-major: x (6, TN), out (16, TN); samples on the 128-wide lane axis."""
    x = x_ref[...]                                   # (6, TN)
    p = p_ref[...]                                   # (16, 9) = [W^T | b | gain | bias]

    # Linear 6->16 as an unrolled VPU MAC over full 128-lane vregs.
    # TODO(synk): on v7x, if a bundle dump shows the 4 VALU slots saturating,
    # use stride-0 sublane-broadcast loads or move this onto the MXU.
    v = p[:, NODE_IN:NODE_IN + 1] + p[:, 0:1] * x[0:1, :]
    for k in range(1, NODE_IN):
        v = v + p[:, k:k + 1] * x[k:k + 1, :]

    # Normalize across the 16 output features (sublane axis), unbiased variance.
    mu = jnp.sum(v, axis=0, keepdims=True) * (1.0 / EMBED_DIM)        # (1, TN)
    c = v - mu                                                        # (16, TN)
    var = jnp.sum(c * c, axis=0, keepdims=True) * (1.0 / (EMBED_DIM - 1))
    inv = lax.rsqrt(var + EPS)                                        # EUP, exact enough for 1e-5

    gain = p[:, NODE_IN + 1:NODE_IN + 2]
    bias = p[:, NODE_IN + 2:NODE_IN + 3]
    o_ref[...] = (c * inv * gain + bias).astype(o_ref.dtype)


def _dihedral_sm_kernel(p_ref, x_ref, o_ref):
    """Sample-major (drop-in layout): x (TM, 6), out (TM, 16) — zero wrapper plumbing."""
    p = p_ref[...]                                   # (9, 16) rows: [W; b; gain; bias]
    x = x_ref[...]                                   # (TM, 6)

    # Unrolled f32 MAC on the VPU (no MXU: keeps exact f32 and avoids matmul
    # precision-mode mismatches vs. the reference).
    v = p[NODE_IN:NODE_IN + 1, :] + x[:, 0:1] * p[0:1, :]             # (TM, 16)
    for k in range(1, NODE_IN):
        v = v + x[:, k:k + 1] * p[k:k + 1, :]

    mu = jnp.sum(v, axis=-1, keepdims=True) * (1.0 / EMBED_DIM)       # (TM, 1)
    c = v - mu
    var = jnp.sum(c * c, axis=-1, keepdims=True) * (1.0 / (EMBED_DIM - 1))
    inv = lax.rsqrt(var + EPS)

    gain = p[NODE_IN + 1:NODE_IN + 2, :]
    bias = p[NODE_IN + 2:NODE_IN + 3, :]
    o_ref[...] = (c * inv * gain + bias).astype(o_ref.dtype)


# ---------------------------------------------------------------------------
# Parameter fusion (single constant-index DMA per kernel)
# ---------------------------------------------------------------------------
# NOTE on weight layout: `weight` is (NODE_IN, EMBED_DIM) = (6, 16), i.e. the
# TRANSPOSE of PyTorch nn.Linear.weight (which is (out, in) = (16, 6)).

def _check_params(weight, lin_bias, gain, norm_bias):
    assert weight.shape == (NODE_IN, EMBED_DIM), (
        f"weight must be (NODE_IN, EMBED_DIM)=({NODE_IN},{EMBED_DIM}) — transpose "
        f"PyTorch nn.Linear.weight; got {weight.shape}")
    assert lin_bias.shape[-1] == EMBED_DIM
    assert gain.shape[-1] == EMBED_DIM and norm_bias.shape[-1] == EMBED_DIM


def _fused_params_fm(weight, lin_bias, gain, norm_bias):
    return jnp.concatenate(
        [weight.astype(jnp.float32).T,
         lin_bias.reshape(EMBED_DIM, 1).astype(jnp.float32),
         gain.reshape(EMBED_DIM, 1).astype(jnp.float32),
         norm_bias.reshape(EMBED_DIM, 1).astype(jnp.float32)],
        axis=1)                                      # (16, 9)


def _fused_params_sm(weight, lin_bias, gain, norm_bias):
    return jnp.concatenate(
        [weight.astype(jnp.float32),
         lin_bias.reshape(1, EMBED_DIM).astype(jnp.float32),
         gain.reshape(1, EMBED_DIM).astype(jnp.float32),
         norm_bias.reshape(1, EMBED_DIM).astype(jnp.float32)],
        axis=0)                                      # (9, 16)


# ---------------------------------------------------------------------------
# Wrappers
# ---------------------------------------------------------------------------

def dihedral_features(x, weight, lin_bias, gain, norm_bias, *,
                      tm=4096, out_dtype=jnp.float32):
    """Drop-in DihedralFeatures.forward: x (..., 6) -> (..., 16).

    Sample-major kernel: no transpose / pad / slice passes in the wrapper —
    the only HBM traffic is the kernel's own reads and writes. Pass
    out_dtype=jnp.bfloat16 to halve writeback if the consumer tolerates it.
    """
    _check_params(weight, lin_bias, gain, norm_bias)
    lead = x.shape[:-1]
    n = math.prod(lead) if lead else 1
    x2 = x.reshape(n, NODE_IN).astype(jnp.float32)   # metadata-only reshape
    params = _fused_params_sm(weight, lin_bias, gain, norm_bias)

    tile, grid = _choose_tile(n, 8, tm)
    out = pl.pallas_call(
        _dihedral_sm_kernel,
        out_shape=jax.ShapeDtypeStruct((n, EMBED_DIM), out_dtype),
        grid_spec=pltpu.PrefetchScalarGridSpec(
            num_scalar_prefetch=0,
            grid=(grid,),
            in_specs=[
                pl.BlockSpec((N_PARAM_COLS, EMBED_DIM), lambda i: (0, 0)),  # params
                pl.BlockSpec((tile, NODE_IN), lambda i: (i, 0)),            # x tile
            ],
            out_specs=pl.BlockSpec((tile, EMBED_DIM), lambda i: (i, 0)),
        ),
        compiler_params=pltpu.CompilerParams(
            dimension_semantics=("parallel",),
            vmem_limit_bytes=_VMEM_LIMIT),
    )(params, x2)
    return out.reshape(*lead, EMBED_DIM)


def dihedral_features_fm(x_fm, weight, lin_bias, gain, norm_bias, *,
                         tn=16384, out_dtype=jnp.float32):
    """Feature-major fast path: x_fm (6, n) -> (16, n).

    For callers that keep activations feature-major across the module: lane-
    dense unmasked stores, full-lane VPU work, and zero layout plumbing.
    """
    _check_params(weight, lin_bias, gain, norm_bias)
    assert x_fm.shape[0] == NODE_IN, f"x_fm must be ({NODE_IN}, n); got {x_fm.shape}"
    n = x_fm.shape[1]
    params = _fused_params_fm(weight, lin_bias, gain, norm_bias)

    tile, grid = _choose_tile(n, 128, tn)
    return pl.pallas_call(
        _dihedral_fm_kernel,
        out_shape=jax.ShapeDtypeStruct((EMBED_DIM, n), out_dtype),
        grid_spec=pltpu.PrefetchScalarGridSpec(
            num_scalar_prefetch=0,
            grid=(grid,),
            in_specs=[
                pl.BlockSpec((EMBED_DIM, N_PARAM_COLS), lambda i: (0, 0)),  # params
                pl.BlockSpec((NODE_IN, tile), lambda i: (0, i)),            # x tile
            ],
            out_specs=pl.BlockSpec((EMBED_DIM, tile), lambda i: (0, i)),
        ),
        compiler_params=pltpu.CompilerParams(
            dimension_semantics=("parallel",),
            vmem_limit_bytes=_VMEM_LIMIT),
    )(params, x_fm.astype(jnp.float32))


# ---------------------------------------------------------------------------
# Reference (exact PyTorch semantics) and test
# ---------------------------------------------------------------------------

def reference(x, weight, lin_bias, gain, norm_bias):
    v = jnp.einsum("...i,io->...o", x, weight) + lin_bias
    mu = jnp.mean(v, axis=-1, keepdims=True)
    var = jnp.sum((v - mu) ** 2, axis=-1, keepdims=True) / (EMBED_DIM - 1)  # unbiased
    sigma = jnp.sqrt(var + EPS)
    return gain * (v - mu) / (sigma + EPS) + norm_bias


if __name__ == "__main__":
    key = jax.random.PRNGKey(0)
    k_x, k_x2, k_w, k_b = jax.random.split(key, 4)

    # Parameters (PyTorch Linear-style uniform init bound = 1/sqrt(fan_in)).
    # weight stored as (in=6, out=16) == torch nn.Linear.weight.T.
    bound = 1.0 / (NODE_IN ** 0.5)
    weight = jax.random.uniform(k_w, (NODE_IN, EMBED_DIM), jnp.float32, -bound, bound)
    lin_bias = jax.random.uniform(k_b, (EMBED_DIM,), jnp.float32, -bound, bound)
    gain = jnp.ones((EMBED_DIM,), jnp.float32)        # Normalize.gain init
    norm_bias = jnp.zeros((EMBED_DIM,), jnp.float32)  # Normalize.bias init

    # 1) Drop-in path: (batch, seq, 6) -> (batch, seq, 16), no layout plumbing.
    batch, seq = 2, 8
    x = jax.random.normal(k_x, (batch, seq, NODE_IN), dtype=jnp.float32)
    out = jax.block_until_ready(dihedral_features(x, weight, lin_bias, gain, norm_bias))
    ref = reference(x, weight, lin_bias, gain, norm_bias)
    assert out.shape == (batch, seq, EMBED_DIM)
    assert out.dtype == jnp.float32
    assert jnp.allclose(out, ref, atol=1e-5, rtol=1e-5)

    # 2) Feature-major fast path; n=320 exercises a partial last lane block.
    n_fm = 320
    x_sm = jax.random.normal(k_x2, (n_fm, NODE_IN), dtype=jnp.float32)
    out_fm = jax.block_until_ready(
        dihedral_features_fm(x_sm.T, weight, lin_bias, gain, norm_bias))
    ref_fm = reference(x_sm, weight, lin_bias, gain, norm_bias)
    assert out_fm.shape == (EMBED_DIM, n_fm)
    assert jnp.allclose(out_fm.T, ref_fm, atol=1e-5, rtol=1e-5)

    # 3) bf16 writeback option (halves output HBM traffic).
    out_bf16 = jax.block_until_ready(
        dihedral_features(x, weight, lin_bias, gain, norm_bias, out_dtype=jnp.bfloat16))
    assert out_bf16.dtype == jnp.bfloat16
    assert jnp.allclose(out_bf16.astype(jnp.float32), ref, atol=2e-2, rtol=2e-2)

    print("KERNEL_OK")
</pallas_src>

<mosaic_0001>
module attributes {stable_mosaic.version = 11 : i64} {
  func.func @_dihedral_sm_kernel(%arg0: i32, %arg1: memref<9x16xf32, #tpu.memory_space<vmem>>, %arg2: memref<16x6xf32, #tpu.memory_space<vmem>>, %arg3: memref<16x16xf32, #tpu.memory_space<vmem>>) attributes {dimension_semantics = [#tpu.dimension_semantics<parallel>], iteration_bounds = array<i64: 1>, scalar_prefetch = 0 : i64, scratch_operands = 0 : i64, tpu.core_type = #tpu.core_type<tc>, window_params = [{pipeline_mode = #tpu.pipeline_mode<synchronous>, transform_indices = @transform_0, window_bounds = array<i64: 9, 16>}, {transform_indices = @transform_1, window_bounds = array<i64: 16, 6>}, {transform_indices = @transform_2, window_bounds = array<i64: 16, 16>}]} {
    %c0 = arith.constant 0 : index
    %c0_0 = arith.constant 0 : index
    %0 = vector.load %arg1[%c0, %c0_0] : memref<9x16xf32, #tpu.memory_space<vmem>>, vector<9x16xf32>
    %c0_1 = arith.constant 0 : index
    %c0_2 = arith.constant 0 : index
    %1 = vector.load %arg2[%c0_1, %c0_2] : memref<16x6xf32, #tpu.memory_space<vmem>>, vector<16x6xf32>
    %2 = vector.extract_strided_slice %0 {offsets = [6, 0], sizes = [1, 16], strides = [1, 1]} : vector<9x16xf32> to vector<1x16xf32>
    %3 = vector.extract_strided_slice %1 {offsets = [0, 0], sizes = [16, 1], strides = [1, 1]} : vector<16x6xf32> to vector<16x1xf32>
    %4 = vector.extract_strided_slice %0 {offsets = [0, 0], sizes = [1, 16], strides = [1, 1]} : vector<9x16xf32> to vector<1x16xf32>
    %5 = vector.broadcast %3 : vector<16x1xf32> to vector<16x16xf32>
    %6 = vector.broadcast %4 : vector<1x16xf32> to vector<16x16xf32>
    %7 = arith.mulf %5, %6 : vector<16x16xf32>
    %8 = vector.broadcast %2 : vector<1x16xf32> to vector<16x16xf32>
    %9 = arith.addf %8, %7 : vector<16x16xf32>
    %10 = vector.extract_strided_slice %1 {offsets = [0, 1], sizes = [16, 1], strides = [1, 1]} : vector<16x6xf32> to vector<16x1xf32>
    %11 = vector.extract_strided_slice %0 {offsets = [1, 0], sizes = [1, 16], strides = [1, 1]} : vector<9x16xf32> to vector<1x16xf32>
    %12 = vector.broadcast %10 : vector<16x1xf32> to vector<16x16xf32>
    %13 = vector.broadcast %11 : vector<1x16xf32> to vector<16x16xf32>
    %14 = arith.mulf %12, %13 : vector<16x16xf32>
    %15 = arith.addf %9, %14 : vector<16x16xf32>
    %16 = vector.extract_strided_slice %1 {offsets = [0, 2], sizes = [16, 1], strides = [1, 1]} : vector<16x6xf32> to vector<16x1xf32>
    %17 = vector.extract_strided_slice %0 {offsets = [2, 0], sizes = [1, 16], strides = [1, 1]} : vector<9x16xf32> to vector<1x16xf32>
    %18 = vector.broadcast %16 : vector<16x1xf32> to vector<16x16xf32>
    %19 = vector.broadcast %17 : vector<1x16xf32> to vector<16x16xf32>
    %20 = arith.mulf %18, %19 : vector<16x16xf32>
    %21 = arith.addf %15, %20 : vector<16x16xf32>
    %22 = vector.extract_strided_slice %1 {offsets = [0, 3], sizes = [16, 1], strides = [1, 1]} : vector<16x6xf32> to vector<16x1xf32>
    %23 = vector.extract_strided_slice %0 {offsets = [3, 0], sizes = [1, 16], strides = [1, 1]} : vector<9x16xf32> to vector<1x16xf32>
    %24 = vector.broadcast %22 : vector<16x1xf32> to vector<16x16xf32>
    %25 = vector.broadcast %23 : vector<1x16xf32> to vector<16x16xf32>
    %26 = arith.mulf %24, %25 : vector<16x16xf32>
    %27 = arith.addf %21, %26 : vector<16x16xf32>
    %28 = vector.extract_strided_slice %1 {offsets = [0, 4], sizes = [16, 1], strides = [1, 1]} : vector<16x6xf32> to vector<16x1xf32>
    %29 = vector.extract_strided_slice %0 {offsets = [4, 0], sizes = [1, 16], strides = [1, 1]} : vector<9x16xf32> to vector<1x16xf32>
    %30 = vector.broadcast %28 : vector<16x1xf32> to vector<16x16xf32>
    %31 = vector.broadcast %29 : vector<1x16xf32> to vector<16x16xf32>
    %32 = arith.mulf %30, %31 : vector<16x16xf32>
    %33 = arith.addf %27, %32 : vector<16x16xf32>
    %34 = vector.extract_strided_slice %1 {offsets = [0, 5], sizes = [16, 1], strides = [1, 1]} : vector<16x6xf32> to vector<16x1xf32>
    %35 = vector.extract_strided_slice %0 {offsets = [5, 0], sizes = [1, 16], strides = [1, 1]} : vector<9x16xf32> to vector<1x16xf32>
    %36 = vector.broadcast %34 : vector<16x1xf32> to vector<16x16xf32>
    %37 = vector.broadcast %35 : vector<1x16xf32> to vector<16x16xf32>
    %38 = arith.mulf %36, %37 : vector<16x16xf32>
    %39 = arith.addf %33, %38 : vector<16x16xf32>
    %cst = arith.constant dense<0.000000e+00> : vector<16xf32>
    %40 = vector.multi_reduction <add>, %39, %cst [1] : vector<16x16xf32> to vector<16xf32>
    %41 = vector.shape_cast %40 : vector<16xf32> to vector<16x1xf32>
    %cst_3 = arith.constant 6.250000e-02 : f32
    %42 = vector.broadcast %cst_3 : f32 to vector<16x1xf32>
    %43 = arith.mulf %41, %42 : vector<16x1xf32>
    %44 = vector.broadcast %43 : vector<16x1xf32> to vector<16x16xf32>
    %45 = arith.subf %39, %44 : vector<16x16xf32>
    %46 = arith.mulf %45, %45 : vector<16x16xf32>
    %cst_4 = arith.constant dense<0.000000e+00> : vector<16xf32>
    %47 = vector.multi_reduction <add>, %46, %cst_4 [1] : vector<16x16xf32> to vector<16xf32>
    %48 = vector.shape_cast %47 : vector<16xf32> to vector<16x1xf32>
    %cst_5 = arith.constant 0.0666666701 : f32
    %49 = vector.broadcast %cst_5 : f32 to vector<16x1xf32>
    %50 = arith.mulf %48, %49 : vector<16x1xf32>
    %cst_6 = arith.constant 9.99999997E-7 : f32
    %51 = vector.broadcast %cst_6 : f32 to vector<16x1xf32>
    %52 = arith.addf %50, %51 : vector<16x1xf32>
    %53 = math.rsqrt %52 : vector<16x1xf32>
    %54 = vector.extract_strided_slice %0 {offsets = [7, 0], sizes = [1, 16], strides = [1, 1]} : vector<9x16xf32> to vector<1x16xf32>
    %55 = vector.extract_strided_slice %0 {offsets = [8, 0], sizes = [1, 16], strides = [1, 1]} : vector<9x16xf32> to vector<1x16xf32>
    %56 = vector.broadcast %53 : vector<16x1xf32> to vector<16x16xf32>
    %57 = arith.mulf %45, %56 : vector<16x16xf32>
    %58 = vector.broadcast %54 : vector<1x16xf32> to vector<16x16xf32>
    %59 = arith.mulf %57, %58 : vector<16x16xf32>
    %60 = vector.broadcast %55 : vector<1x16xf32> to vector<16x16xf32>
    %61 = arith.addf %59, %60 : vector<16x16xf32>
    %c0_7 = arith.constant 0 : index
    %c0_8 = arith.constant 0 : index
    %62 = vector.load %arg3[%c0_7, %c0_8] : memref<16x16xf32, #tpu.memory_space<vmem>>, vector<16x16xf32>
    tpu.vector_store %arg3[%c0_7, %c0_8], %61 {strides = array<i32>} : memref<16x16xf32, #tpu.memory_space<vmem>>, vector<16x16xf32>,
    return
  }
  func.func @transform_0(%arg0: i32) -> (i32, i32) {
    %c0_i32 = arith.constant 0 : i32
    %c0_i32_0 = arith.constant 0 : i32
    %c0_i32_1 = arith.constant 0 : i32
    return %c0_i32, %c0_i32_0 : i32, i32
  }
  func.func @transform_1(%arg0: i32) -> (i32, i32) {
    %c0_i32 = arith.constant 0 : i32
    %c0_i32_0 = arith.constant 0 : i32
    return %arg0, %c0_i32 : i32, i32
  }
  func.func @transform_2(%arg0: i32) -> (i32, i32) {
    %c0_i32 = arith.constant 0 : i32
    %c0_i32_0 = arith.constant 0 : i32
    return %arg0, %c0_i32 : i32, i32
  }
}

</mosaic_0001>

<bundles_post_ra>
// kernel: tpu_custom_call.1
= control target key start
LH: loop header
LB: loop body
LE: loop exit
PB: predicated region body
PF: predicated region fallthrough
CT: control target
= control target key end

     0   :  { %v222_v1 = vmov 1   ;;  %v223_v2 = vmov 0   ;;  %s296_s0 = inlined_call_operand.vmem [shape: f32[9,16], index: 0, kind: input, shape index: {}]   ;;  %s297_s1 = inlined_call_operand.vmem [shape: f32[16,6], index: 1, kind: input, shape index: {}]   ;;  %s298_s2 = inlined_call_operand.hbm [shape: f32[16,16], index: 2, kind: output, shape index: {}]  }
   0x1   :  { %v14_v0 = vld [vmem:[%s297_s1] sm:$0xff]  ;;  %186 = vset.pattern.permute.xlu1 %v222_v1  ;;  %185 = vset.pattern.permute.xlu0 %v223_v2 }
   0x2   :  { %7 = vsyncpa [#allocation3], 0  ;;  %39 = vperm.xlu1 %186, %v14_v0   ;;  %18 = vperm.xlu0 %185, %v14_v0   ;;  %v15_v3 = vld [vmem:[%s297_s1 + $0x8] sm:$0xff]  ;;  %v224_v4 = vmov 2   ;;  %v225_v5 = vmov 3   ;;  %v226_v6 = vmov 4   ;;  %v26_v8 = vlaneseq }
   0x3   :  { %v227_v7 = vmov 5   ;;  %v258_v13 = vld [vmem:[%s296_s0] sm:$0xff]  ;;  %vm118_vm0 = vcmask 130048   ;;  %s228_s16 = smov [#allocation2]  }
   0x4   :  { %v252_v9 = vshrl.u32 %v26_v8, 7  ;;  %s164_s17 = sshll.u32 %s228_s16, 4  ;;  %s165_s17 = int_to_ptr.vmem [resolvable:$true] %s164_s17 }
   0x5   :  { %s198_s18 = scalar_lea.vmem %s165_s17, 256  ;;  %p203_p1 = scmp.lt.s32.totalorder %s165_s17, %s165_s17 }
   0x6   :  { %43 = vperm.xlu1 %186, %v15_v3   ;;  %23 = vperm.xlu0 %185, %v15_v3   ;;  %v28_v11 = vsub.s32 0, %v252_v9  ;;  %v34_v14 = vsub.s32 6, %v252_v9  ;;  %v48_v18 = vsub.s32 1, %v252_v9  ;;  %v64_v19 = vsub.s32 2, %v252_v9  ;;  %p199_p0 = scmp.ne.s32.totalorder %s165_s17, %s198_s18  ;;  %p204_p2 = scmp.lt.s32.totalorder %s198_s18, %s198_s18 }
   0x7   :  { %v80_v22 = vsub.s32 3, %v252_v9  ;;  %v96_v29 = vsub.s32 4, %v252_v9  ;;  %v112_v30 = vsub.s32 5, %v252_v9 }
   0x8   :  { %v29_v15 = vrot.slane %v258_v13, %v28_v11  ;;  %v35_v21 = vrot.slane %v258_v13, %v34_v14  ;;  %v49_v25 = vrot.slane %v258_v13, %v48_v18  ;;  %v65_v26 = vrot.slane %v258_v13, %v64_v19  ;;  %p205_p3 = por %p204_p2, %p203_p1 }
   0x9   :  { %v81_v28 = vrot.slane %v258_v13, %v80_v22  ;;  %v97_v38 = vrot.slane %v258_v13, %v96_v29  ;;  %v113_v39 = vrot.slane %v258_v13, %v112_v30 }
   0xa   :  { %188 = vset.pattern.permute.xlu1 %v224_v4  ;;  %187 = vset.pattern.permute.xlu0 %v224_v4  ;;  %p206_p4 = pnand %p205_p3, %p199_p0 }
   0xb   :  { %59 = vperm.xlu1 %188, %v15_v3   ;;  %55 = vperm.xlu0 %187, %v14_v0  }
   0xf   :  { %189 = vset.pattern.permute.xlu1 %v225_v5  ;;  %190 = vset.pattern.permute.xlu0 %v225_v5 }
  0x10   :  { %71 = vperm.xlu1 %189, %v14_v0   ;;  %75 = vperm.xlu0 %190, %v15_v3  }
  0x14   :  { %191 = vset.pattern.permute.xlu1 %v226_v6  ;;  %192 = vset.pattern.permute.xlu0 %v227_v7 }
  0x15   :  { %87 = vperm.xlu1 %191, %v14_v0   ;;  %103 = vperm.xlu0 %192, %v14_v0  }
  0x19   :  { %91 = vperm.xlu1 %191, %v15_v3  }
  0x1d   :  { %193 = vset.pattern.permute.xlu1 %v227_v7 }
  0x1e   :  { %107 = vperm.xlu1 %193, %v15_v3  }
  0x81   :  { %v40_v10 = vpop.permute.xlu1 %39  ;;  %v19_v12 = vpop.permute.xlu0 %18 }
  0x82   :  { %v30_v20 = vmul.f32 %v29_v15, %v19_v12  ;;  %v50_v32 = vmul.f32 %v49_v25, %v40_v10 }
  0x84   :  { %v36_v27 = vadd.f32 %v35_v21, %v30_v20 }
  0x85   :  { %v44_v16 = vpop.permute.xlu1 %43  ;;  %v24_v17 = vpop.permute.xlu0 %23 }
  0x86   :  { %v31_v31 = vmul.f32 %v29_v15, %v24_v17  ;;  %v52_v36 = vadd.f32 %v50_v32, %v36_v27  ;;  %v51_v42 = vmul.f32 %v49_v25, %v44_v16  ;;  %v147_v17 = vsub.s32 7, %v252_v9 }
  0x88   :  { %v37_v40 = vadd.f32 %v35_v21, %v31_v31  ;;  %v148_v18 = vrot.slane %v258_v13, %v147_v17  ;;  %v175_v21 = vld [vmem:[%s296_s0 + $0x8] ss:$0 sm:$0xff] }
  0x8a   :  { %v60_v23 = vpop.permute.xlu1 %59  ;;  %v56_v24 = vpop.permute.xlu0 %55  ;;  %v53_v48 = vadd.f32 %v51_v42, %v37_v40 }
  0x8b   :  { %v66_v33 = vmul.f32 %v65_v26, %v56_v24  ;;  %v67_v49 = vmul.f32 %v65_v26, %v60_v23 }
  0x8d   :  { %v68_v41 = vadd.f32 %v66_v33, %v52_v36  ;;  %v69_v54 = vadd.f32 %v67_v49, %v53_v48 }
  0x8f   :  { %v72_v34 = vpop.permute.xlu1 %71  ;;  %v76_v35 = vpop.permute.xlu0 %75 }
  0x90   :  { %v82_v37 = vmul.f32 %v81_v28, %v72_v34  ;;  %v83_v51 = vmul.f32 %v81_v28, %v76_v35 }
  0x92   :  { %v84_v45 = vadd.f32 %v82_v37, %v68_v41  ;;  %v85_v57 = vadd.f32 %v83_v51, %v69_v54 }
  0x94   :  { %v88_v43 = vpop.permute.xlu1 %87  ;;  %v104_v44 = vpop.permute.xlu0 %103 }
  0x95   :  { %v98_v46 = vmul.f32 %v97_v38, %v88_v43  ;;  %v114_v47 = vmul.f32 %v113_v39, %v104_v44 }
  0x97   :  { %v100_v50 = vadd.f32 %v98_v46, %v84_v45 }
  0x98   :  { %v92_v52 = vpop.permute.xlu1 %91 }
  0x99   :  { %v116_v53 = vadd.f32 %v114_v47, %v100_v50  ;;  %v99_v55 = vmul.f32 %v97_v38, %v92_v52 }
  0x9b   :  { %v119_v56 = vsel %vm118_vm0, %v116_v53, 0.0  ;;  %v101_v59 = vadd.f32 %v99_v55, %v85_v57 }
  0x9c   :  { %120 = vadd.xlane.f32.xlu1 %v119_v56 }
  0x9d   :  { %v108_v58 = vpop.permute.xlu1 %107 }
  0x9e   :  { %v115_v60 = vmul.f32 %v113_v39, %v108_v58 }
  0xa0   :  { %v117_v61 = vadd.f32 %v115_v60, %v101_v59 }
  0xa2   :  { %v122_v62 = vsel %vm118_vm0, %v117_v61, 0.0 }
  0xa3   :  { %123 = vadd.xlane.f32.xlu0 %v122_v62 }
 0x129   :  { %v121_v63 = vpop.xlane.xlu1 %120 }
 0x12a   :  { %v125_v0 = vmul.f32 0.0625, %v121_v63 }
 0x12c   :  { %v127_v1 = vsub.f32 %v116_v53, %v125_v0 }
 0x12e   :  { %v129_v2 = vmul.f32 %v127_v1, %v127_v1 }
 0x130   :  { %v124_v3 = vpop.xlane.xlu0 %123  ;;  %v131_v4 = vsel %vm118_vm0, %v129_v2, 0.0 }
 0x131   :  { %v126_v5 = vmul.f32 0.0625, %v124_v3  ;;  %132 = vadd.xlane.f32.xlu0 %v131_v4 }
 0x133   :  { %v128_v6 = vsub.f32 %v117_v61, %v126_v5 }
 0x135   :  { %v130_v7 = vmul.f32 %v128_v6, %v128_v6 }
 0x137   :  { %v134_v8 = vsel %vm118_vm0, %v130_v7, 0.0 }
 0x138   :  { %135 = vadd.xlane.f32.xlu1 %v134_v8 }
 0x1be   :  { %v133_v10 = vpop.xlane.xlu0 %132 }
 0x1bf   :  { %v137_v11 = vmul.f32 0.06666667, %v133_v10 }
 0x1c1   :  { %v139_v12 = vadd.f32 1e-06, %v137_v11 }
 0x1c3   :  { %194 = vrsqrt.f32 %v139_v12 }
 0x1c5   :  { %v136_v14 = vpop.xlane.xlu1 %135 }
 0x1c6   :  { %v138_v15 = vmul.f32 0.06666667, %v136_v14 }
 0x1c8   :  { %v140_v16 = vadd.f32 1e-06, %v138_v15 }
 0x1ca   :  { %196 = vrsqrt.f32 %v140_v16 }
 0x1cd   :  { %v195_v19 = vpop.eup %194 }
 0x1ce   :  { %v143_v20 = vmul.f32 %v195_v19, %v127_v1 }
 0x1d0   :  { %v149_v22 = vmul.f32 %v148_v18, %v143_v20 }
 0x1d2   :  { %v155_v23 = vadd.f32 %v175_v21, %v149_v22 }
 0x1d4   :  { %v197_v24 = vpop.eup %196  ;;  %157 = vst.msk [vmem:[#allocation2] sm:$0xff] %vm118_vm0, %v155_v23 }
 0x1d5   :  { %v144_v25 = vmul.f32 %v197_v24, %v128_v6 }
 0x1d7   :  { %v150_v26 = vmul.f32 %v148_v18, %v144_v25 }
 0x1d9   :  { %v156_v9 = vadd.f32 %v175_v21, %v150_v26 }
 0x1db   :  { %158 = vst.msk [vmem:[#allocation2 + $0x8] sm:$0xff] %vm118_vm0, %v156_v9 }
 0x1dc   :  { %209 = shalt.err (!%p206_p4)
}
 0x1dd   :  { %s210_s20 = scalar_lea.hbm %s298_s2, 256 }
 0x1de   :  { %p211_p5 = scmp.ne.s32.totalorder %s298_s2, %s210_s20  ;;  %p214_p6 = scmp.lt.u32.totalorder %s210_s20, %s298_s2 }
 0x1e0   :  { %p216_p7 = pnand %p214_p6, %p211_p5 }
 0x1e2   :  { %219 = shalt.err (!%p216_p7)
}
 0x1e3   :  { %s229_s25 = smov 128   ;;  %s230_s26 = smov 8  }
 0x1e4   :  { %170 = dma.vmem_to_hbm [thread:$0]  %s165_s17, 256, %s298_s2, [#allocation3], %s229_s25, %s229_s25, %s230_s26  }
 0x1e5   :  { %220 = dma.done.wait [#allocation3], 256  }
 0x1e6   :  { %221 = vsyncadd [#allocation3], 4294967040 }
 0x1e7   :  { %174 = vsyncpa [#allocation3], 1 }

</bundles_post_ra>
